<compile_context>
chip_gen: v6e
topology: v6e:2x2x1
jax: 0.10.0
libtpu: 0.0.40
codegen_flags: <defaults>
</compile_context>

<pallas_src>
import functools

import jax
import jax.numpy as jnp
from jax.experimental import pallas as pl
from jax.experimental.pallas import tpu as pltpu


def rnn_kernel(u_ref, w_hh_ref, w_fc_ref, b_fc_ref, o_ref):
    # u_ref:    (T*B_pad, H) f32   precomputed x*W_ih^T + (b_ih + b_hh), time-major
    # w_hh_ref: (H, H)       bf16  rnn.weight_hh.T
    # w_fc_ref: (H, O_pad)   bf16  fc.weight.T zero-padded to 128 lanes
    # b_fc_ref: (1, O_pad)   f32
    # o_ref:    (B_pad, O_pad) f32
    B = o_ref.shape[0]
    T = u_ref.shape[0] // B

    # Recurrent weight loaded once; the identical RHS is reused by every
    # per-step jnp.dot below.
    # TODO(synk): if the bundle dump shows Mosaic re-pushing this 128-row RHS
    # every step, switch to pltpu.matmul_push_rhs / matmul_acc_lhs / matmul_pop
    # to hold W_hh stationary in the MXU across the time loop.
    w_hh = w_hh_ref[...]

    # t = 0: hidden starts at zero, so h_0 = tanh(u_0)  (one matmul saved).
    h = jnp.tanh(u_ref[0:B, :])

    # Serial recurrence: only dot + add + tanh on the critical path.
    # bf16 operands -> single MXU pass; f32 accumulation via preferred type.
    # Static Python unroll is fine at T=8; for large T use lax.fori_loop with
    # u_ref[pl.ds(pl.multiple_of(t * B, 8), B), :] slices.
    for t in range(1, T):
        pre = (jnp.dot(h.astype(jnp.bfloat16), w_hh,
                       preferred_element_type=jnp.float32)
               + u_ref[t * B:(t + 1) * B, :])
        h = jnp.tanh(pre)                     # tanh / adds stay f32

    # Final FC: bf16 operands (single MXU pass), f32 accumulate, lane-dense
    # 128-padded output -> unmasked stores.  Wrapper slices [:, :10].
    o_ref[...] = (jnp.dot(h.astype(jnp.bfloat16), w_fc_ref[...],
                          preferred_element_type=jnp.float32)
                  + b_fc_ref[...])


def prepare_params(w_ih, w_hh, b_ih, b_hh, w_fc, b_fc):
    """One-time (init-time) weight preprocessing, hoisted out of the forward.

    Returns padded / transposed / cast arrays consumed directly by the kernel.
    """
    H = w_hh.shape[0]
    O = w_fc.shape[0]
    O_pad = max(128, ((O + 127) // 128) * 128)  # lane-dense FC output
    return {
        "w_ih_row": w_ih.T.astype(jnp.float32),                        # (1, H)
        "bias": (b_ih + b_hh).reshape(1, H).astype(jnp.float32),       # (1, H)
        "w_hh_bf": w_hh.T.astype(jnp.bfloat16),                        # (H, H)
        "w_fc_bf": jnp.zeros((H, O_pad), jnp.bfloat16).at[:, :O].set(
            w_fc.T.astype(jnp.bfloat16)),                              # (H, O_pad)
        "b_fc_pad": jnp.zeros((1, O_pad), jnp.float32).at[:, :O].set(
            b_fc.reshape(1, O).astype(jnp.float32)),                   # (1, O_pad)
    }


@functools.partial(jax.jit, static_argnames=("out_dim",))
def rnn_model1_forward(x, params, *, out_dim):
    """x: (B, T, 1) float32, params from prepare_params -> (B, out_dim) f32."""
    B, T, _ = x.shape
    w_ih_row = params["w_ih_row"]
    bias = params["bias"]
    w_hh_bf = params["w_hh_bf"]
    w_fc_bf = params["w_fc_bf"]
    b_fc_pad = params["b_fc_pad"]
    H = w_hh_bf.shape[0]
    O_pad = w_fc_bf.shape[1]

    B_pad = max(8, ((B + 7) // 8) * 8)          # sublane-aligned batch

    # Time-major, batch-padded x, and the hoisted input projection
    # u = x * W_ih^T + (b_ih + b_hh) for all timesteps.  Fused by XLA inside
    # this jitted wrapper; (T*B_pad, H) f32 = 32 KiB at these sizes.  Padded
    # batch rows carry just the bias (finite) and are sliced away below.
    x_tb = jnp.zeros((T, B_pad), jnp.float32).at[:, :B].set(
        x[..., 0].astype(jnp.float32).T)
    u = x_tb.reshape(T * B_pad, 1) * w_ih_row + bias          # (T*B_pad, H)

    vmem = pl.BlockSpec(memory_space=pltpu.MemorySpace.VMEM)
    out = pl.pallas_call(
        rnn_kernel,
        out_shape=jax.ShapeDtypeStruct((B_pad, O_pad), jnp.float32),
        in_specs=[vmem] * 4,
        out_specs=vmem,
    )(u, w_hh_bf, w_fc_bf, b_fc_pad)

    return out[:B, :out_dim]


def _xavier_normal(key, shape):
    # PyTorch xavier_normal_: std = sqrt(2 / (fan_in + fan_out)), gain = 1.
    fan_out, fan_in = shape
    std = (2.0 / (fan_in + fan_out)) ** 0.5
    return std * jax.random.normal(key, shape, dtype=jnp.float32)


def _reference_forward_f32(x, w_ih, w_hh, b_ih, b_hh, w_fc, b_fc):
    # Pure f32 reference matching the PyTorch module math.
    B, T, _ = x.shape
    H = w_hh.shape[0]
    h = jnp.zeros((B, H), jnp.float32)
    for t in range(T):
        h = jnp.tanh(x[:, t] @ w_ih.T + b_ih + h @ w_hh.T + b_hh)
    return h @ w_fc.T + b_fc


def _reference_forward_emulated(x, w_ih, w_hh, b_ih, b_hh, w_fc, b_fc):
    # Reference emulating the kernel exactly: hoisted u, bf16 MXU operands on
    # both the recurrent and FC matmuls, f32 accumulation throughout.
    B, T, _ = x.shape
    H = w_hh.shape[0]
    w_ih_row = w_ih.T                              # (1, H)
    w_hh_bf = w_hh.T.astype(jnp.bfloat16)          # (H, H)
    bias = (b_ih + b_hh).reshape(1, H)
    u = x[..., 0].T.reshape(T * B, 1) * w_ih_row + bias        # (T*B, H)
    h = jnp.tanh(u[0:B])
    for t in range(1, T):
        h = jnp.tanh(jnp.dot(h.astype(jnp.bfloat16), w_hh_bf,
                             preferred_element_type=jnp.float32)
                     + u[t * B:(t + 1) * B])
    return (jnp.dot(h.astype(jnp.bfloat16), w_fc.T.astype(jnp.bfloat16),
                    preferred_element_type=jnp.float32)
            + b_fc.reshape(1, -1))


if __name__ == "__main__":
    H, O = 128, 10
    B, T = 2, 8

    key = jax.random.PRNGKey(0)
    k_x, k_ih, k_hh, k_fc = jax.random.split(key, 4)

    # Parameters (deterministic, matching the module's __init__).
    w_ih = _xavier_normal(k_ih, (H, 1))      # rnn.weight_ih
    w_hh = _xavier_normal(k_hh, (H, H))      # rnn.weight_hh
    b_ih = jnp.zeros((H,), jnp.float32)      # rnn.bias_ih
    b_hh = jnp.zeros((H,), jnp.float32)      # rnn.bias_hh
    w_fc = _xavier_normal(k_fc, (O, H))      # fc.weight
    b_fc = jnp.zeros((O,), jnp.float32)      # fc.bias

    # One-time weight preprocessing (hoisted out of the per-call path).
    params = prepare_params(w_ih, w_hh, b_ih, b_hh, w_fc, b_fc)

    # Example input: (batch=2, seq=8, input_size=1)
    x = jax.random.normal(k_x, (B, T, 1), dtype=jnp.float32)

    out = rnn_model1_forward(x, params, out_dim=O)
    out = jax.block_until_ready(out)
    assert out.shape == (B, O)

    # Tight check against a reference using the same bf16 MXU operands on both
    # matmuls (validates kernel structure / padding / hoisting exactly).
    ref_emul = _reference_forward_emulated(x, w_ih, w_hh, b_ih, b_hh, w_fc, b_fc)
    assert jnp.max(jnp.abs(out - ref_emul)) < 2e-3, \
        float(jnp.max(jnp.abs(out - ref_emul)))

    # Looser check against the pure-f32 PyTorch-equivalent forward; bf16
    # rounding compounds through 8 recurrent tanh steps + the bf16 FC, hence
    # the wider tolerance.
    ref_f32 = _reference_forward_f32(x, w_ih, w_hh, b_ih, b_hh, w_fc, b_fc)
    assert jnp.max(jnp.abs(out - ref_f32)) < 3e-2, \
        float(jnp.max(jnp.abs(out - ref_f32)))

    print("KERNEL_OK")
</pallas_src>

<mosaic_0001>
module attributes {stable_mosaic.version = 11 : i64} {
  func.func @rnn_kernel(%arg0: memref<64x128xf32, #tpu.memory_space<vmem>>, %arg1: memref<128x128xbf16, #tpu.memory_space<vmem>>, %arg2: memref<128x128xbf16, #tpu.memory_space<vmem>>, %arg3: memref<1x128xf32, #tpu.memory_space<vmem>>, %arg4: memref<8x128xf32, #tpu.memory_space<vmem>>) attributes {dimension_semantics = [], scalar_prefetch = 0 : i64, scratch_operands = 0 : i64, tpu.core_type = #tpu.core_type<tc>} {
    %c0 = arith.constant 0 : index
    %c0_0 = arith.constant 0 : index
    %0 = vector.load %arg1[%c0, %c0_0] : memref<128x128xbf16, #tpu.memory_space<vmem>>, vector<128x128xbf16>
    %c0_1 = arith.constant 0 : index
    %c0_2 = arith.constant 0 : index
    %1 = vector.load %arg0[%c0_1, %c0_2] : memref<64x128xf32, #tpu.memory_space<vmem>>, vector<8x128xf32>
    %2 = math.tanh %1 : vector<8x128xf32>
    %3 = arith.truncf %2 : vector<8x128xf32> to vector<8x128xbf16>
    %cst = arith.constant dense<0.000000e+00> : vector<8x128xf32>
    %4 = tpu.matmul %3, %0, %cst {dimension_numbers = #tpu.dot_dimension_numbers<[1], [0], [0], [1], [0, 0, 1, 1], [], []>} : vector<8x128xbf16>, vector<128x128xbf16>, vector<8x128xf32> -> vector<8x128xf32>
    %c8 = arith.constant 8 : index
    %c0_3 = arith.constant 0 : index
    %5 = vector.load %arg0[%c8, %c0_3] : memref<64x128xf32, #tpu.memory_space<vmem>>, vector<8x128xf32>
    %6 = arith.addf %4, %5 : vector<8x128xf32>
    %7 = math.tanh %6 : vector<8x128xf32>
    %8 = arith.truncf %7 : vector<8x128xf32> to vector<8x128xbf16>
    %cst_4 = arith.constant dense<0.000000e+00> : vector<8x128xf32>
    %9 = tpu.matmul %8, %0, %cst_4 {dimension_numbers = #tpu.dot_dimension_numbers<[1], [0], [0], [1], [0, 0, 1, 1], [], []>} : vector<8x128xbf16>, vector<128x128xbf16>, vector<8x128xf32> -> vector<8x128xf32>
    %c16 = arith.constant 16 : index
    %c0_5 = arith.constant 0 : index
    %10 = vector.load %arg0[%c16, %c0_5] : memref<64x128xf32, #tpu.memory_space<vmem>>, vector<8x128xf32>
    %11 = arith.addf %9, %10 : vector<8x128xf32>
    %12 = math.tanh %11 : vector<8x128xf32>
    %13 = arith.truncf %12 : vector<8x128xf32> to vector<8x128xbf16>
    %cst_6 = arith.constant dense<0.000000e+00> : vector<8x128xf32>
    %14 = tpu.matmul %13, %0, %cst_6 {dimension_numbers = #tpu.dot_dimension_numbers<[1], [0], [0], [1], [0, 0, 1, 1], [], []>} : vector<8x128xbf16>, vector<128x128xbf16>, vector<8x128xf32> -> vector<8x128xf32>
    %c24 = arith.constant 24 : index
    %c0_7 = arith.constant 0 : index
    %15 = vector.load %arg0[%c24, %c0_7] : memref<64x128xf32, #tpu.memory_space<vmem>>, vector<8x128xf32>
    %16 = arith.addf %14, %15 : vector<8x128xf32>
    %17 = math.tanh %16 : vector<8x128xf32>
    %18 = arith.truncf %17 : vector<8x128xf32> to vector<8x128xbf16>
    %cst_8 = arith.constant dense<0.000000e+00> : vector<8x128xf32>
    %19 = tpu.matmul %18, %0, %cst_8 {dimension_numbers = #tpu.dot_dimension_numbers<[1], [0], [0], [1], [0, 0, 1, 1], [], []>} : vector<8x128xbf16>, vector<128x128xbf16>, vector<8x128xf32> -> vector<8x128xf32>
    %c32 = arith.constant 32 : index
    %c0_9 = arith.constant 0 : index
    %20 = vector.load %arg0[%c32, %c0_9] : memref<64x128xf32, #tpu.memory_space<vmem>>, vector<8x128xf32>
    %21 = arith.addf %19, %20 : vector<8x128xf32>
    %22 = math.tanh %21 : vector<8x128xf32>
    %23 = arith.truncf %22 : vector<8x128xf32> to vector<8x128xbf16>
    %cst_10 = arith.constant dense<0.000000e+00> : vector<8x128xf32>
    %24 = tpu.matmul %23, %0, %cst_10 {dimension_numbers = #tpu.dot_dimension_numbers<[1], [0], [0], [1], [0, 0, 1, 1], [], []>} : vector<8x128xbf16>, vector<128x128xbf16>, vector<8x128xf32> -> vector<8x128xf32>
    %c40 = arith.constant 40 : index
    %c0_11 = arith.constant 0 : index
    %25 = vector.load %arg0[%c40, %c0_11] : memref<64x128xf32, #tpu.memory_space<vmem>>, vector<8x128xf32>
    %26 = arith.addf %24, %25 : vector<8x128xf32>
    %27 = math.tanh %26 : vector<8x128xf32>
    %28 = arith.truncf %27 : vector<8x128xf32> to vector<8x128xbf16>
    %cst_12 = arith.constant dense<0.000000e+00> : vector<8x128xf32>
    %29 = tpu.matmul %28, %0, %cst_12 {dimension_numbers = #tpu.dot_dimension_numbers<[1], [0], [0], [1], [0, 0, 1, 1], [], []>} : vector<8x128xbf16>, vector<128x128xbf16>, vector<8x128xf32> -> vector<8x128xf32>
    %c48 = arith.constant 48 : index
    %c0_13 = arith.constant 0 : index
    %30 = vector.load %arg0[%c48, %c0_13] : memref<64x128xf32, #tpu.memory_space<vmem>>, vector<8x128xf32>
    %31 = arith.addf %29, %30 : vector<8x128xf32>
    %32 = math.tanh %31 : vector<8x128xf32>
    %33 = arith.truncf %32 : vector<8x128xf32> to vector<8x128xbf16>
    %cst_14 = arith.constant dense<0.000000e+00> : vector<8x128xf32>
    %34 = tpu.matmul %33, %0, %cst_14 {dimension_numbers = #tpu.dot_dimension_numbers<[1], [0], [0], [1], [0, 0, 1, 1], [], []>} : vector<8x128xbf16>, vector<128x128xbf16>, vector<8x128xf32> -> vector<8x128xf32>
    %c56 = arith.constant 56 : index
    %c0_15 = arith.constant 0 : index
    %35 = vector.load %arg0[%c56, %c0_15] : memref<64x128xf32, #tpu.memory_space<vmem>>, vector<8x128xf32>
    %36 = arith.addf %34, %35 : vector<8x128xf32>
    %37 = math.tanh %36 : vector<8x128xf32>
    %38 = arith.truncf %37 : vector<8x128xf32> to vector<8x128xbf16>
    %c0_16 = arith.constant 0 : index
    %c0_17 = arith.constant 0 : index
    %39 = vector.load %arg2[%c0_16, %c0_17] : memref<128x128xbf16, #tpu.memory_space<vmem>>, vector<128x128xbf16>
    %cst_18 = arith.constant dense<0.000000e+00> : vector<8x128xf32>
    %40 = tpu.matmul %38, %39, %cst_18 {dimension_numbers = #tpu.dot_dimension_numbers<[1], [0], [0], [1], [0, 0, 1, 1], [], []>} : vector<8x128xbf16>, vector<128x128xbf16>, vector<8x128xf32> -> vector<8x128xf32>
    %c0_19 = arith.constant 0 : index
    %c0_20 = arith.constant 0 : index
    %41 = vector.load %arg3[%c0_19, %c0_20] : memref<1x128xf32, #tpu.memory_space<vmem>>, vector<1x128xf32>
    %42 = vector.broadcast %41 : vector<1x128xf32> to vector<8x128xf32>
    %43 = arith.addf %40, %42 : vector<8x128xf32>
    %c0_21 = arith.constant 0 : index
    %c0_22 = arith.constant 0 : index
    %44 = vector.load %arg4[%c0_21, %c0_22] : memref<8x128xf32, #tpu.memory_space<vmem>>, vector<8x128xf32>
    tpu.vector_store %arg4[%c0_21, %c0_22], %43 {strides = array<i32>} : memref<8x128xf32, #tpu.memory_space<vmem>>, vector<8x128xf32>,
    return
  }
}

</mosaic_0001>

<bundles_post_ra>
// kernel: mul.8
= control target key start
LH: loop header
LB: loop body
LE: loop exit
PB: predicated region body
PF: predicated region fallthrough
CT: control target
= control target key end

     0   :  { %s69_s10 = smov 56   ;;  %s70_s11 = smov 40   ;;  %vm3_vm0 = vcmask 64512   ;;  %vm9_vm1 = vcmask 523712   ;;  %vm15_vm2 = vcmask 458112   ;;  %vm21_vm3 = vcmask 392512   ;;  %s113_s0 = inlined_call_operand.vmem [shape: f32[8,8], index: 0, kind: input, shape index: {}]   ;;  %s114_s1 = inlined_call_operand.vmem [shape: f32[64], index: 1, kind: output, shape index: {}]  }
   0x1   :  { %v55_v0 = vld [vmem:[%s113_s0 + $0x7] sm:$0x1]   ;;  %v57_v1 = vld [vmem:[%s113_s0 + $0x5] sm:$0x1]   ;;  %v56_v2 = vld [vmem:[%s113_s0 + $0x6] sm:$0x1]  }
   0x2   :  { %7 = vrot.lane.b32.xlu0 %v55_v0, %s69_s10  ;;  %19 = vrot.lane.b32.xlu1 %v57_v1, %s70_s11  ;;  %v58_v3 = vld [vmem:[%s113_s0 + $0x4] sm:$0x1]   ;;  %v2_v4 = vld [vmem:[%s113_s0] sm:$0x1]   ;;  %s71_s18 = smov 48   ;;  %s72_s19 = smov 32  }
   0x3   :  { %4 = vst.msk [vmem:[#allocation0] sm:$0x1] %vm3_vm0, %v2_v4   ;;  %v59_v5 = vld [vmem:[%s113_s0 + $0x3] sm:$0x1]   ;;  %v60_v6 = vld [vmem:[%s113_s0 + $0x2] sm:$0x1]  }
   0x4   :  { %s73_s24 = smov 24   ;;  %s74_s25 = smov 16   ;;  %v61_v7 = vld [vmem:[%s113_s0 + $0x1] sm:$0x1]   ;;  %vm27_vm4 = vcmask 326912   ;;  %vm33_vm5 = vcmask 261312  }
   0x5   :  { %s75_s0 = smov 8   ;;  %vm39_vm6 = vcmask 195712   ;;  %vm45_vm7 = vcmask 130112  }
   0x6   :  { %13 = vrot.lane.b32.xlu0 %v56_v2, %s71_s18  ;;  %25 = vrot.lane.b32.xlu1 %v58_v3, %s72_s19 }
   0xa   :  { %31 = vrot.lane.b32.xlu0 %v59_v5, %s73_s24  ;;  %37 = vrot.lane.b32.xlu1 %v60_v6, %s74_s25 }
   0xe   :  { %43 = vrot.lane.b32.xlu0 %v61_v7, %s75_s0 }
  0x74   :  { %v8_v8 = vpop.permute.xlu0 %7   ;;  %v20_v9 = vpop.permute.xlu1 %19  }
  0x75   :  { %10 = vst.msk [vmem:[#allocation0] sm:$0x1] %vm9_vm1, %v8_v8  }
  0x78   :  { %v14_v10 = vpop.permute.xlu0 %13   ;;  %v26_v11 = vpop.permute.xlu1 %25  }
  0x79   :  { %16 = vst.msk [vmem:[#allocation0] sm:$0x1] %vm15_vm2, %v14_v10  }
  0x7a   :  { %22 = vst.msk [vmem:[#allocation0] sm:$0x1] %vm21_vm3, %v20_v9  }
  0x7b   :  { %28 = vst.msk [vmem:[#allocation0] sm:$0x1] %vm27_vm4, %v26_v11  }
  0x7c   :  { %v32_v12 = vpop.permute.xlu0 %31   ;;  %v38_v13 = vpop.permute.xlu1 %37  }
  0x7d   :  { %34 = vst.msk [vmem:[#allocation0] sm:$0x1] %vm33_vm5, %v32_v12  }
  0x7e   :  { %40 = vst.msk [vmem:[#allocation0] sm:$0x1] %vm39_vm6, %v38_v13  }
  0x80   :  { %v44_v14 = vpop.permute.xlu0 %43  }
  0x81   :  { %46 = vst.msk [vmem:[#allocation0] sm:$0x1] %vm45_vm7, %v44_v14  }
  0x88   :  { %v51_v15 = vld [vmem:[#allocation0] sm:$0x1] }
  0x89   :  { %54 = vst [vmem:[%s114_s1] sm:$0x1] %v51_v15 }

// kernel: rnn_model1_forward.1
= control target key start
LH: loop header
LB: loop body
LE: loop exit
PB: predicated region body
PF: predicated region fallthrough
CT: control target
= control target key end

     0   :  { %9 = vsyncpa [#allocation3], 0  ;;  %s825_s15 = smov [#allocation2]   ;;  %s1064_s0 = inlined_call_operand.vmem [shape: f32[64,128], index: 0, kind: input, shape index: {}]   ;;  %s1065_s1 = inlined_call_operand.vmem [shape: bf16[128,128], index: 1, kind: input, shape index: {}]   ;;  %s1066_s2 = inlined_call_operand.hbm [shape: bf16[128,128], index: 2, kind: input, shape index: {}]   ;;  %s1067_s3 = inlined_call_operand.vmem [shape: f32[1,128], index: 3, kind: input, shape index: {}]   ;;  %s1068_s4 = inlined_call_operand.vmem [shape: f32[8,128], index: 4, kind: output, shape index: {}]  }
   0x1   :  { %s19_s16 = sshll.u32 %s825_s15, 4  ;;  %s20_s16 = int_to_ptr.vmem [resolvable:$true] %s19_s16 }
   0x2   :  { %s811_s17 = scalar_lea.vmem %s20_s16, 1024  ;;  %p816_p1 = scmp.lt.s32.totalorder %s20_s16, %s20_s16 }
   0x3   :  { %p812_p0 = scmp.ne.s32.totalorder %s20_s16, %s811_s17  ;;  %p817_p2 = scmp.lt.s32.totalorder %s811_s17, %s811_s17 }
   0x5   :  { %p818_p3 = por %p817_p2, %p816_p1 }
   0x7   :  { %p819_p4 = pnand %p818_p3, %p812_p0 }
   0x9   :  { %822 = shalt.err (!%p819_p4)
}
   0xa   :  { %s826_s18 = smov 64   ;;  %s827_s19 = smov 4  }
   0xb   :  { %25 = dma.hbm_to_vmem [thread:$0]  %s1066_s2, 1024, %s20_s16, [#allocation3], %s826_s18, %s826_s18, %s827_s19  }
   0xc   :  { %823 = dma.done.wait [#allocation3], 1024  }
   0xd   :  { %824 = vsyncadd [#allocation3], 4294966272  ;;  %v828_v0 = vmov 0.0   ;;  %vm829_vm0 = vmmov 0   ;;  %v867_v1 = vld [vmem:[%s1065_s1 + $0x38] sm:$0xff]   ;;  %v873_v2 = vld [vmem:[%s1065_s1 + $0x30] sm:$0xff]  }
   0xe   :  { %606 = vmatprep.subr.bf16.mxu0 %v828_v0  ;;  %622 = vmatprep.mubr.msk.bf16.mxu0 %vm829_vm0, %v828_v0  ;;  %v882_v3 = vld [vmem:[%s1065_s1 + $0x28] sm:$0xff]   ;;  %v890_v4 = vld [vmem:[%s1065_s1 + $0x20] sm:$0xff]   ;;  %v903_v6 = vld [vmem:[%s1065_s1 + $0x18] sm:$0xff]  }
   0xf   :  { %626 = vmatprep.subr.bf16.mxu1 %v828_v0  ;;  %642 = vmatprep.mubr.msk.bf16.mxu1 %vm829_vm0, %v828_v0  ;;  %v48_v5 = vld [vmem:[%s1064_s0] sm:$0xff]  ;;  %v912_v7 = vld [vmem:[%s1065_s1 + $0x10] sm:$0xff]   ;;  %v921_v8 = vld [vmem:[%s1065_s1 + $0x8] sm:$0xff]  }
  0x10   :  { %607 = vmatpush3.bf16.msra.mxu0 %v867_v1  ;;  %627 = vmatpush3.bf16.msra.mxu1 %v867_v1  ;;  %787 = vtanh.f32 %v48_v5  ;;  %v930_v10 = vld [vmem:[%s1065_s1] sm:$0xff]   ;;  %v51_v12 = vld [vmem:[%s1064_s0 + $0x8] sm:$0xff]  ;;  %v142_v20 = vld [vmem:[%s1064_s0 + $0x10] sm:$0xff] }
  0x11   :  { %608 = vmatprep.subr.bf16.mxu0 %v828_v0  ;;  %628 = vmatprep.subr.bf16.mxu1 %v828_v0  ;;  %v185_v28 = vld [vmem:[%s1064_s0 + $0x18] sm:$0xff]  ;;  %v228_v36 = vld [vmem:[%s1064_s0 + $0x20] sm:$0xff]  ;;  %v271_v44 = vld [vmem:[%s1064_s0 + $0x28] sm:$0xff] }
  0x12   :  { %v779_v52 = vld [vmem:[#allocation2 + $0x38] sm:$0xff]   ;;  %v780_v53 = vld [vmem:[#allocation2 + $0x30] sm:$0xff]   ;;  %v781_v54 = vld [vmem:[#allocation2 + $0x28] sm:$0xff]  }
  0x13   :  { %v314_v55 = vld [vmem:[%s1064_s0 + $0x30] sm:$0xff]  ;;  %v782_v63 = vld [vmem:[#allocation2 + $0x20] sm:$0xff]   ;;  %v357_v5 = vld [vmem:[%s1064_s0 + $0x38] sm:$0xff] }
  0x14   :  { %609 = vmatpush3.bf16.msra.mxu0 %v873_v2  ;;  %629 = vmatpush3.bf16.msra.mxu1 %v873_v2 }
  0x15   :  { %610 = vmatprep.subr.bf16.mxu0 %v828_v0  ;;  %630 = vmatprep.subr.bf16.mxu1 %v828_v0 }
  0x18   :  { %611 = vmatpush3.bf16.msra.mxu0 %v882_v3  ;;  %631 = vmatpush3.bf16.msra.mxu1 %v882_v3 }
  0x19   :  { %612 = vmatprep.subr.bf16.mxu0 %v828_v0  ;;  %632 = vmatprep.subr.bf16.mxu1 %v828_v0 }
  0x1c   :  { %613 = vmatpush3.bf16.msra.mxu0 %v890_v4  ;;  %633 = vmatpush3.bf16.msra.mxu1 %v890_v4 }
  0x1d   :  { %614 = vmatprep.subr.bf16.mxu0 %v828_v0  ;;  %634 = vmatprep.subr.bf16.mxu1 %v828_v0  ;;  %v788_v9 = vpop.eup %787 }
  0x1e   :  { %v50_v11 = vpack.c.bf16 %v788_v9, %v788_v9 }
  0x20   :  { %615 = vmatpush3.bf16.msra.mxu0 %v903_v6  ;;  %635 = vmatpush3.bf16.msra.mxu1 %v903_v6 }
  0x21   :  { %616 = vmatprep.subr.bf16.mxu0 %v828_v0  ;;  %636 = vmatprep.subr.bf16.mxu1 %v828_v0 }
  0x24   :  { %617 = vmatpush3.bf16.msra.mxu0 %v912_v7  ;;  %637 = vmatpush3.bf16.msra.mxu1 %v912_v7 }
  0x25   :  { %618 = vmatprep.subr.bf16.mxu0 %v828_v0  ;;  %638 = vmatprep.subr.bf16.mxu1 %v828_v0 }
  0x28   :  { %619 = vmatpush3.bf16.msra.mxu0 %v921_v8  ;;  %639 = vmatpush3.bf16.msra.mxu1 %v921_v8 }
  0x29   :  { %620 = vmatprep.subr.bf16.mxu0 %v828_v0  ;;  %640 = vmatprep.subr.bf16.mxu1 %v828_v0 }
  0x2c   :  { %621 = vmatpush3.bf16.msra.mxu0 %v930_v10  ;;  %641 = vmatpush3.bf16.msra.mxu1 %v930_v10 }
  0x2d   :  { %646 = vmatprep.subr.bf16.mxu0 %v828_v0  ;;  %666 = vmatprep.subr.bf16.mxu1 %v828_v0 }
  0x2f   :  { %623 = vmatmul.mubr.bf16.vlgmr.msra.gmra.mxu0 %v50_v11 }
  0x30   :  { %647 = vmatpush3.bf16.msra.mxu0 %v867_v1  ;;  %662 = vmatprep.mubr.msk.bf16.mxu0 %vm829_vm0, %v828_v0 }
  0x31   :  { %648 = vmatprep.subr.bf16.mxu0 %v828_v0 }
  0x34   :  { %649 = vmatpush3.bf16.msra.mxu0 %v873_v2 }
  0x35   :  { %650 = vmatprep.subr.bf16.mxu0 %v828_v0 }
  0x38   :  { %651 = vmatpush3.bf16.msra.mxu0 %v882_v3 }
  0x39   :  { %652 = vmatprep.subr.bf16.mxu0 %v828_v0 }
  0x3c   :  { %653 = vmatpush3.bf16.msra.mxu0 %v890_v4 }
  0x3d   :  { %654 = vmatprep.subr.bf16.mxu0 %v828_v0 }
  0x40   :  { %655 = vmatpush3.bf16.msra.mxu0 %v903_v6 }
  0x41   :  { %656 = vmatprep.subr.bf16.mxu0 %v828_v0 }
  0x44   :  { %657 = vmatpush3.bf16.msra.mxu0 %v912_v7 }
  0x45   :  { %658 = vmatprep.subr.bf16.mxu0 %v828_v0 }
  0x48   :  { %659 = vmatpush3.bf16.msra.mxu0 %v921_v8 }
  0x49   :  { %660 = vmatprep.subr.bf16.mxu0 %v828_v0 }
  0x4c   :  { %661 = vmatpush3.bf16.msra.mxu0 %v930_v10 }
  0x4d   :  { %686 = vmatprep.subr.bf16.mxu0 %v828_v0 }
  0xef   :  { %v134_v13 = vpop.f32.mrf.mxu0 }
  0xf0   :  { %v135_v14 = vadd.f32 %v134_v13, %v51_v12  ;;  %v525_v13 = vld [vmem:[%s1067_s3] ss:$0 sm:$0xff] }
  0xf1   :  { %v624_v15 = vpop.f32.mrf.mxu0 }
  0xf2   :  { %789 = vtanh.f32 %v135_v14 }
  0xf3   :  { %v137_v16 = vpop.f32.mrf.mxu0 }
  0xf5   :  { %v625_v17 = vpop.f32.mrf.mxu0 }
  0xff   :  { %v790_v18 = vpop.eup %789 }
 0x100   :  { %v141_v19 = vpack.c.bf16 %v790_v18, %v790_v18 }
 0x102   :  { %643 = vmatmul.mubr.bf16.vlgmr.msra.gmra.mxu1 %v141_v19 }
 0x103   :  { %667 = vmatpush3.bf16.msra.mxu1 %v867_v1  ;;  %682 = vmatprep.mubr.msk.bf16.mxu1 %vm829_vm0, %v828_v0 }
 0x104   :  { %668 = vmatprep.subr.bf16.mxu1 %v828_v0 }
 0x107   :  { %669 = vmatpush3.bf16.msra.mxu1 %v873_v2 }
 0x108   :  { %670 = vmatprep.subr.bf16.mxu1 %v828_v0 }
 0x10b   :  { %671 = vmatpush3.bf16.msra.mxu1 %v882_v3 }
 0x10c   :  { %672 = vmatprep.subr.bf16.mxu1 %v828_v0 }
 0x10f   :  { %673 = vmatpush3.bf16.msra.mxu1 %v890_v4 }
 0x110   :  { %674 = vmatprep.subr.bf16.mxu1 %v828_v0 }
 0x113   :  { %675 = vmatpush3.bf16.msra.mxu1 %v903_v6 }
 0x114   :  { %676 = vmatprep.subr.bf16.mxu1 %v828_v0 }
 0x117   :  { %677 = vmatpush3.bf16.msra.mxu1 %v912_v7 }
 0x118   :  { %678 = vmatprep.subr.bf16.mxu1 %v828_v0 }
 0x11b   :  { %679 = vmatpush3.bf16.msra.mxu1 %v921_v8 }
 0x11c   :  { %680 = vmatprep.subr.bf16.mxu1 %v828_v0 }
 0x11f   :  { %681 = vmatpush3.bf16.msra.mxu1 %v930_v10 }
 0x120   :  { %706 = vmatprep.subr.bf16.mxu1 %v828_v0 }
 0x1c2   :  { %v177_v21 = vpop.f32.mrf.mxu1 }
 0x1c3   :  { %v178_v22 = vadd.f32 %v177_v21, %v142_v20 }
 0x1c4   :  { %v644_v23 = vpop.f32.mrf.mxu1 }
 0x1c5   :  { %791 = vtanh.f32 %v178_v22 }
 0x1c6   :  { %v180_v24 = vpop.f32.mrf.mxu1 }
 0x1c8   :  { %v645_v25 = vpop.f32.mrf.mxu1 }
 0x1d2   :  { %v792_v26 = vpop.eup %791 }
 0x1d3   :  { %v184_v27 = vpack.c.bf16 %v792_v26, %v792_v26 }
 0x1d5   :  { %663 = vmatmul.mubr.bf16.vlgmr.msra.gmra.mxu0 %v184_v27 }
 0x1d6   :  { %687 = vmatpush3.bf16.msra.mxu0 %v867_v1  ;;  %702 = vmatprep.mubr.msk.bf16.mxu0 %vm829_vm0, %v828_v0 }
 0x1d7   :  { %688 = vmatprep.subr.bf16.mxu0 %v828_v0 }
 0x1da   :  { %689 = vmatpush3.bf16.msra.mxu0 %v873_v2 }
 0x1db   :  { %690 = vmatprep.subr.bf16.mxu0 %v828_v0 }
 0x1de   :  { %691 = vmatpush3.bf16.msra.mxu0 %v882_v3 }
 0x1df   :  { %692 = vmatprep.subr.bf16.mxu0 %v828_v0 }
 0x1e2   :  { %693 = vmatpush3.bf16.msra.mxu0 %v890_v4 }
 0x1e3   :  { %694 = vmatprep.subr.bf16.mxu0 %v828_v0 }
 0x1e6   :  { %695 = vmatpush3.bf16.msra.mxu0 %v903_v6 }
 0x1e7   :  { %696 = vmatprep.subr.bf16.mxu0 %v828_v0 }
 0x1ea   :  { %697 = vmatpush3.bf16.msra.mxu0 %v912_v7 }
 0x1eb   :  { %698 = vmatprep.subr.bf16.mxu0 %v828_v0 }
 0x1ee   :  { %699 = vmatpush3.bf16.msra.mxu0 %v921_v8 }
 0x1ef   :  { %700 = vmatprep.subr.bf16.mxu0 %v828_v0 }
 0x1f2   :  { %701 = vmatpush3.bf16.msra.mxu0 %v930_v10 }
 0x1f3   :  { %726 = vmatprep.subr.bf16.mxu0 %v828_v0 }
 0x295   :  { %v220_v29 = vpop.f32.mrf.mxu0 }
 0x296   :  { %v221_v30 = vadd.f32 %v220_v29, %v185_v28 }
 0x297   :  { %v664_v31 = vpop.f32.mrf.mxu0 }
 0x298   :  { %793 = vtanh.f32 %v221_v30 }
 0x299   :  { %v223_v32 = vpop.f32.mrf.mxu0 }
 0x29b   :  { %v665_v33 = vpop.f32.mrf.mxu0 }
 0x2a5   :  { %v794_v34 = vpop.eup %793 }
 0x2a6   :  { %v227_v35 = vpack.c.bf16 %v794_v34, %v794_v34 }
 0x2a8   :  { %683 = vmatmul.mubr.bf16.vlgmr.msra.gmra.mxu1 %v227_v35 }
 0x2a9   :  { %707 = vmatpush3.bf16.msra.mxu1 %v867_v1  ;;  %722 = vmatprep.mubr.msk.bf16.mxu1 %vm829_vm0, %v828_v0 }
 0x2aa   :  { %708 = vmatprep.subr.bf16.mxu1 %v828_v0 }
 0x2ad   :  { %709 = vmatpush3.bf16.msra.mxu1 %v873_v2 }
 0x2ae   :  { %710 = vmatprep.subr.bf16.mxu1 %v828_v0 }
 0x2b1   :  { %711 = vmatpush3.bf16.msra.mxu1 %v882_v3 }
 0x2b2   :  { %712 = vmatprep.subr.bf16.mxu1 %v828_v0 }
 0x2b5   :  { %713 = vmatpush3.bf16.msra.mxu1 %v890_v4 }
 0x2b6   :  { %714 = vmatprep.subr.bf16.mxu1 %v828_v0 }
 0x2b9   :  { %715 = vmatpush3.bf16.msra.mxu1 %v903_v6 }
 0x2ba   :  { %716 = vmatprep.subr.bf16.mxu1 %v828_v0 }
 0x2bd   :  { %717 = vmatpush3.bf16.msra.mxu1 %v912_v7 }
 0x2be   :  { %718 = vmatprep.subr.bf16.mxu1 %v828_v0 }
 0x2c1   :  { %719 = vmatpush3.bf16.msra.mxu1 %v921_v8 }
 0x2c2   :  { %720 = vmatprep.subr.bf16.mxu1 %v828_v0 }
 0x2c5   :  { %721 = vmatpush3.bf16.msra.mxu1 %v930_v10 }
 0x2c6   :  { %746 = vmatprep.subr.bf16.mxu1 %v828_v0 }
 0x368   :  { %v263_v37 = vpop.f32.mrf.mxu1 }
 0x369   :  { %v264_v38 = vadd.f32 %v263_v37, %v228_v36 }
 0x36a   :  { %v684_v39 = vpop.f32.mrf.mxu1 }
 0x36b   :  { %795 = vtanh.f32 %v264_v38 }
 0x36c   :  { %v266_v40 = vpop.f32.mrf.mxu1 }
 0x36e   :  { %v685_v41 = vpop.f32.mrf.mxu1 }
 0x378   :  { %v796_v42 = vpop.eup %795 }
 0x379   :  { %v270_v43 = vpack.c.bf16 %v796_v42, %v796_v42 }
 0x37b   :  { %703 = vmatmul.mubr.bf16.vlgmr.msra.gmra.mxu0 %v270_v43 }
 0x37c   :  { %727 = vmatpush3.bf16.msra.mxu0 %v867_v1  ;;  %742 = vmatprep.mubr.msk.bf16.mxu0 %vm829_vm0, %v828_v0  ;;  %v783_v1 = vld [vmem:[#allocation2 + $0x18] sm:$0xff]  }
 0x37d   :  { %728 = vmatprep.subr.bf16.mxu0 %v828_v0 }
 0x380   :  { %729 = vmatpush3.bf16.msra.mxu0 %v873_v2  ;;  %v784_v2 = vld [vmem:[#allocation2 + $0x10] sm:$0xff]  }
 0x381   :  { %730 = vmatprep.subr.bf16.mxu0 %v828_v0 }
 0x384   :  { %731 = vmatpush3.bf16.msra.mxu0 %v882_v3  ;;  %v785_v3 = vld [vmem:[#allocation2 + $0x8] sm:$0xff]  }
 0x385   :  { %732 = vmatprep.subr.bf16.mxu0 %v828_v0 }
 0x388   :  { %733 = vmatpush3.bf16.msra.mxu0 %v890_v4  ;;  %v786_v4 = vld [vmem:[#allocation2] sm:$0xff]  }
 0x389   :  { %734 = vmatprep.subr.bf16.mxu0 %v828_v0 }
 0x38c   :  { %735 = vmatpush3.bf16.msra.mxu0 %v903_v6 }
 0x38d   :  { %736 = vmatprep.subr.bf16.mxu0 %v828_v0 }
 0x390   :  { %737 = vmatpush3.bf16.msra.mxu0 %v912_v7 }
 0x391   :  { %738 = vmatprep.subr.bf16.mxu0 %v828_v0 }
 0x394   :  { %739 = vmatpush3.bf16.msra.mxu0 %v921_v8 }
 0x395   :  { %740 = vmatprep.subr.bf16.mxu0 %v828_v0 }
 0x398   :  { %741 = vmatpush3.bf16.msra.mxu0 %v930_v10 }
 0x43b   :  { %v306_v45 = vpop.f32.mrf.mxu0 }
 0x43c   :  { %v307_v46 = vadd.f32 %v306_v45, %v271_v44 }
 0x43d   :  { %v704_v47 = vpop.f32.mrf.mxu0 }
 0x43e   :  { %797 = vtanh.f32 %v307_v46 }
 0x43f   :  { %v309_v48 = vpop.f32.mrf.mxu0 }
 0x441   :  { %v705_v49 = vpop.f32.mrf.mxu0 }
 0x44b   :  { %v798_v50 = vpop.eup %797 }
 0x44c   :  { %v313_v51 = vpack.c.bf16 %v798_v50, %v798_v50 }
 0x44e   :  { %723 = vmatmul.mubr.bf16.vlgmr.msra.gmra.mxu1 %v313_v51 }
 0x44f   :  { %762 = vmatprep.mubr.msk.bf16.mxu1 %vm829_vm0, %v828_v0  ;;  %747 = vmatpush3.bf16.msra.mxu1 %v779_v52 }
 0x450   :  { %748 = vmatprep.subr.bf16.mxu1 %v828_v0 }
 0x453   :  { %749 = vmatpush3.bf16.msra.mxu1 %v780_v53 }
 0x454   :  { %750 = vmatprep.subr.bf16.mxu1 %v828_v0 }
 0x457   :  { %751 = vmatpush3.bf16.msra.mxu1 %v781_v54 }
 0x458   :  { %752 = vmatprep.subr.bf16.mxu1 %v828_v0 }
 0x45b   :  { %753 = vmatpush3.bf16.msra.mxu1 %v782_v63 }
 0x45c   :  { %754 = vmatprep.subr.bf16.mxu1 %v828_v0 }
 0x45f   :  { %755 = vmatpush3.bf16.msra.mxu1 %v783_v1 }
 0x460   :  { %756 = vmatprep.subr.bf16.mxu1 %v828_v0 }
 0x463   :  { %757 = vmatpush3.bf16.msra.mxu1 %v784_v2 }
 0x464   :  { %758 = vmatprep.subr.bf16.mxu1 %v828_v0 }
 0x467   :  { %759 = vmatpush3.bf16.msra.mxu1 %v785_v3 }
 0x468   :  { %760 = vmatprep.subr.bf16.mxu1 %v828_v0 }
 0x46b   :  { %761 = vmatpush3.bf16.msra.mxu1 %v786_v4 }
 0x50e   :  { %v349_v56 = vpop.f32.mrf.mxu1 }
 0x50f   :  { %v350_v57 = vadd.f32 %v349_v56, %v314_v55 }
 0x510   :  { %v724_v58 = vpop.f32.mrf.mxu1 }
 0x511   :  { %799 = vtanh.f32 %v350_v57 }
 0x512   :  { %v352_v59 = vpop.f32.mrf.mxu1 }
 0x514   :  { %v725_v60 = vpop.f32.mrf.mxu1 }
 0x51e   :  { %v800_v61 = vpop.eup %799 }
 0x51f   :  { %v356_v62 = vpack.c.bf16 %v800_v61, %v800_v61 }
 0x521   :  { %743 = vmatmul.mubr.bf16.vlgmr.msra.gmra.mxu0 %v356_v62 }
 0x5e1   :  { %v392_v6 = vpop.f32.mrf.mxu0 }
 0x5e2   :  { %v393_v7 = vadd.f32 %v392_v6, %v357_v5 }
 0x5e3   :  { %v744_v8 = vpop.f32.mrf.mxu0 }
 0x5e4   :  { %801 = vtanh.f32 %v393_v7 }
 0x5e5   :  { %v395_v9 = vpop.f32.mrf.mxu0 }
 0x5e7   :  { %v745_v10 = vpop.f32.mrf.mxu0 }
 0x5f1   :  { %v802_v11 = vpop.eup %801 }
 0x5f2   :  { %v399_v12 = vpack.c.bf16 %v802_v11, %v802_v11 }
 0x5f4   :  { %763 = vmatmul.mubr.bf16.vlgmr.msra.gmra.mxu1 %v399_v12 }
 0x6b4   :  { %v505_v0 = vpop.f32.mrf.mxu1 }
 0x6b5   :  { %v506_v14 = vadd.f32 %v525_v13, %v505_v0 }
 0x6b6   :  { %v764_v15 = vpop.f32.mrf.mxu1 }
 0x6b7   :  { %511 = vst [vmem:[%s1068_s4] sm:$0xff] %v506_v14 }
 0x6b8   :  { %v508_v16 = vpop.f32.mrf.mxu1 }
 0x6ba   :  { %v765_v17 = vpop.f32.mrf.mxu1 }
 0x6bb   :  { %516 = vsyncpa [#allocation3], 1 }

</bundles_post_ra>
